<compile_context>
chip_gen: v7x
topology: tpu7x:2x2x1
jax: 0.10.0
libtpu: 0.0.40
codegen_flags: <defaults>
</compile_context>

<pallas_src>
import jax
import jax.numpy as jnp
from jax.experimental import pallas as pl
from jax.experimental.pallas import tpu as pltpu


def _round_up(x, m):
    return (x + m - 1) // m * m


def _blackbox_kernel(x_ref, noise_ref, mean_ref, std_ref, w_ref, bias_ref,
                     pair_ref, feat_ref, dist_ref):
    k = pl.program_id(1)
    nk = pl.num_programs(1)

    # feat output block is resident across the K axis -> use it as the f32
    # accumulator directly (no scratch).
    @pl.when(k == 0)
    def _():
        feat_ref[...] = jnp.zeros_like(feat_ref)

    x = x_ref[...]                                   # (bm, tk) f32
    # invert_normalization: x * std + mean
    x = x * std_ref[...] + mean_ref[...]
    # batch.clamp(0, 1)
    x = jnp.clip(x, 0.0, 1.0)
    # batch + randn * 0.01  (noise streamed in, generated in the wrapper)
    x = x + noise_ref[...] * 0.01
    # apply_normalization is folded into the streamed weight (see wrapper):
    #   feat = x @ (diag(1/std) @ W) - (mean/std) @ W
    feat_ref[...] += jnp.dot(x.astype(w_ref.dtype), w_ref[...],
                             preferred_element_type=jnp.float32)

    @pl.when(k == nk - 1)
    def _():
        feat = feat_ref[...] - bias_ref[...]         # (bm, F_pad)
        # l2_normalize with rsqrt (EUP slot) + eps (avoids div-by-zero NaN/Inf)
        sumsq = jnp.sum(feat * feat, axis=1, keepdims=True)
        out = feat * jax.lax.rsqrt(sumsq + 1e-12)
        feat_ref[...] = out
        # dist = sum((pair_img_features - output)^2, axis=1); lane-dense slab
        diff = pair_ref[...] - out
        d = jnp.sum(diff * diff, axis=1, keepdims=True)      # (bm, 1)
        dist_ref[...] = jnp.broadcast_to(d, dist_ref.shape)


def make_blackbox_forward(w, mean_c, std_c, C, H, W, threshold=1.0,
                          tk_target=512):
    """Build a jitted forward for a fixed linear 'model'.

    Weight folding / bf16 cast / padding happen ONCE here (per model), not per
    query.  Returns forward(x_nchw, pair_feat, noise_key) -> (vec_output, feats).
    """
    D = C * H * W
    F = w.shape[1]

    # --- fold apply_normalization into the weight (hoisted, once per model) ---
    mean_full = jnp.repeat(mean_c.astype(jnp.float32), H * W)        # (D,)
    std_full = jnp.repeat(std_c.astype(jnp.float32), H * W)          # (D,)
    inv_std = 1.0 / std_full
    w_f32 = w.astype(jnp.float32)
    w_folded = inv_std[:, None] * w_f32                              # (D, F)
    bias = (mean_full * inv_std) @ w_f32                             # (F,)

    # --- tiling plan ---
    F_pad = _round_up(F, 128)
    D_pad = _round_up(D, 128)
    w_bytes = D_pad * F_pad * 2                                      # bf16
    if w_bytes <= 8 * 1024 * 1024:
        # whole folded weight resident in VMEM: constant index_map, DMA'd once.
        tk = D_pad
    else:
        nk_t = pl.cdiv(D_pad, tk_target)
        tk = _round_up(pl.cdiv(D_pad, nk_t), 128)
        # cap so a double-buffered weight tile stays within ~12 MiB
        max_tk = max(128, ((12 * 1024 * 1024) // (2 * F_pad * 2)) // 128 * 128)
        tk = max(128, min(tk, max_tk))
    D_pad = _round_up(D_pad, tk)
    nk = D_pad // tk

    # --- pad / cast model-side constants once ---
    mean_p = jnp.zeros((1, D_pad), jnp.float32).at[0, :D].set(mean_full)
    std_p = jnp.ones((1, D_pad), jnp.float32).at[0, :D].set(std_full)
    w_p = jnp.zeros((D_pad, F_pad), jnp.bfloat16).at[:D, :F].set(
        w_folded.astype(jnp.bfloat16))
    bias_p = jnp.zeros((1, F_pad), jnp.float32).at[0, :F].set(bias)

    def forward(x_nchw, pair_feat, noise_key):
        B = x_nchw.shape[0]
        # batch tile: 256 fills v6e/v7x MXU when the batch is big enough.
        bm_cap = 256 if B >= 256 else 128
        bm = min(max(_round_up(B, 8), 8), bm_cap)
        B_pad = _round_up(max(B, bm), bm)
        nb = B_pad // bm

        x2 = x_nchw.reshape(B, D).astype(jnp.float32)
        x_p = jnp.zeros((B_pad, D_pad), jnp.float32).at[:B, :D].set(x2)
        # Gaussian noise for "batch + randn_like(batch) * 0.01" (generated by
        # XLA's fused RNG; stream differs from torch.randn_like bit-for-bit).
        noise_p = jax.random.normal(noise_key, (B_pad, D_pad), jnp.float32)
        pair_p = jnp.zeros((1, F_pad), jnp.float32).at[0, :F].set(
            pair_feat.reshape(F).astype(jnp.float32))

        # VMEM budget derived from the actual tile plan (<= 56 MiB for v7x).
        vmem_est = (2 * (2 * bm * tk * 4            # x + noise (dbl-buffered)
                         + 2 * tk * 4               # mean + std
                         + tk * F_pad * 2           # weight (bf16)
                         + 2 * F_pad * 4)           # bias + pair
                    + bm * F_pad * 4                # resident feat block
                    + bm * 128 * 4)                 # dist slab
        vmem_limit = int(min(max(vmem_est + (4 << 20), 16 << 20), 56 << 20))

        feat_p, dist_slab = pl.pallas_call(
            _blackbox_kernel,
            out_shape=(jax.ShapeDtypeStruct((B_pad, F_pad), jnp.float32),
                       jax.ShapeDtypeStruct((B_pad, 128), jnp.float32)),
            grid_spec=pltpu.PrefetchScalarGridSpec(
                num_scalar_prefetch=0,
                grid=(nb, nk),
                in_specs=[
                    pl.BlockSpec((bm, tk), lambda b, k: (b, k)),      # x
                    pl.BlockSpec((bm, tk), lambda b, k: (b, k)),      # noise
                    pl.BlockSpec((1, tk), lambda b, k: (0, k)),       # mean
                    pl.BlockSpec((1, tk), lambda b, k: (0, k)),       # std
                    pl.BlockSpec((tk, F_pad), lambda b, k: (k, 0)),   # folded W
                    pl.BlockSpec((1, F_pad), lambda b, k: (0, 0)),    # folded bias
                    pl.BlockSpec((1, F_pad), lambda b, k: (0, 0)),    # pair feature
                ],
                out_specs=(pl.BlockSpec((bm, F_pad), lambda b, k: (b, 0)),
                           pl.BlockSpec((bm, 128), lambda b, k: (b, 0))),
            ),
            compiler_params=pltpu.CompilerParams(
                dimension_semantics=("parallel", "arbitrary"),
                vmem_limit_bytes=vmem_limit),
        )(x_p, noise_p, mean_p, std_p, w_p, bias_p, pair_p)

        # Epilogue on small lane-dense outputs (vec_output one-hot built here).
        features = feat_p[:B, :F]
        dist = dist_slab[:B, 0]
        pred = (dist < threshold).astype(jnp.int32)
        vec_output = jax.nn.one_hot(pred, 2, dtype=jnp.float32)
        return vec_output, features

    return jax.jit(forward)


if __name__ == "__main__":
    # Small shapes consistent with the forward: batch=2, channels=3, spatial=16,
    # synthetic linear "model" with feature dim 128.
    B, C, H, W, F = 2, 3, 16, 16, 128
    D = C * H * W

    key = jax.random.PRNGKey(0)
    k_x, k_w, k_pair, k_noise = jax.random.split(key, 4)

    x = jax.random.uniform(k_x, (B, C, H, W), jnp.float32)          # input batch (NCHW)
    mean = jnp.array([0.485, 0.456, 0.406], jnp.float32)            # per-channel mean
    std = jnp.array([0.229, 0.224, 0.225], jnp.float32)             # per-channel std

    # Deterministic synthetic "model": a single linear feature extractor.
    w = jax.random.normal(k_w, (D, F), jnp.float32) * 0.02
    # pair_img_features[0:1]: deterministic l2-normalized reference feature.
    pair = jax.random.normal(k_pair, (F,), jnp.float32)
    pair = pair / jnp.linalg.norm(pair)

    forward = make_blackbox_forward(w, mean, std, C, H, W, threshold=1.0)
    vec_output, features = forward(x, pair, k_noise)
    jax.block_until_ready((vec_output, features))

    assert vec_output.shape == (B, 2)
    assert features.shape == (B, F)
    assert bool(jnp.all(jnp.isfinite(features)))
    print("KERNEL_OK")
</pallas_src>

<mosaic_0001>
module attributes {stable_mosaic.version = 11 : i64} {
  func.func @_blackbox_kernel(%arg0: i32, %arg1: i32, %arg2: memref<8x768xf32, #tpu.memory_space<vmem>>, %arg3: memref<8x768xf32, #tpu.memory_space<vmem>>, %arg4: memref<1x768xf32, #tpu.memory_space<vmem>>, %arg5: memref<1x768xf32, #tpu.memory_space<vmem>>, %arg6: memref<768x128xbf16, #tpu.memory_space<vmem>>, %arg7: memref<1x128xf32, #tpu.memory_space<vmem>>, %arg8: memref<1x128xf32, #tpu.memory_space<vmem>>, %arg9: memref<8x128xf32, #tpu.memory_space<vmem>>, %arg10: memref<8x128xf32, #tpu.memory_space<vmem>>) attributes {dimension_semantics = [#tpu.dimension_semantics<parallel>, #tpu.dimension_semantics<arbitrary>], iteration_bounds = array<i64: 1, 1>, scalar_prefetch = 0 : i64, scratch_operands = 0 : i64, tpu.core_type = #tpu.core_type<tc>, window_params = [{transform_indices = @transform_0, window_bounds = array<i64: 8, 768>}, {transform_indices = @transform_1, window_bounds = array<i64: 8, 768>}, {transform_indices = @transform_2, window_bounds = array<i64: 1, 768>}, {transform_indices = @transform_3, window_bounds = array<i64: 1, 768>}, {transform_indices = @transform_4, window_bounds = array<i64: 768, 128>}, {pipeline_mode = #tpu.pipeline_mode<synchronous>, transform_indices = @transform_5, window_bounds = array<i64: 1, 128>}, {pipeline_mode = #tpu.pipeline_mode<synchronous>, transform_indices = @transform_6, window_bounds = array<i64: 1, 128>}, {transform_indices = @transform_7, window_bounds = array<i64: 8, 128>}, {transform_indices = @transform_8, window_bounds = array<i64: 8, 128>}]} {
    %c0_i32 = arith.constant 0 : i32
    %0 = arith.cmpi eq, %arg1, %c0_i32 : i32
    %1 = arith.extui %0 : i1 to i32
    %c0_i32_0 = arith.constant 0 : i32
    %2 = arith.cmpi ne, %1, %c0_i32_0 : i32
    scf.if %2 {
      %cst_19 = arith.constant 0.000000e+00 : f32
      %27 = vector.broadcast %cst_19 : f32 to vector<8x128xf32>
      %c0_20 = arith.constant 0 : index
      %c0_21 = arith.constant 0 : index
      %28 = vector.load %arg9[%c0_20, %c0_21] : memref<8x128xf32, #tpu.memory_space<vmem>>, vector<8x128xf32>
      tpu.vector_store %arg9[%c0_20, %c0_21], %27 {strides = array<i32>} : memref<8x128xf32, #tpu.memory_space<vmem>>, vector<8x128xf32>,
    } else {
    }
    %c0 = arith.constant 0 : index
    %c0_1 = arith.constant 0 : index
    %3 = vector.load %arg2[%c0, %c0_1] : memref<8x768xf32, #tpu.memory_space<vmem>>, vector<8x768xf32>
    %c0_2 = arith.constant 0 : index
    %c0_3 = arith.constant 0 : index
    %4 = vector.load %arg5[%c0_2, %c0_3] : memref<1x768xf32, #tpu.memory_space<vmem>>, vector<1x768xf32>
    %5 = vector.broadcast %4 : vector<1x768xf32> to vector<8x768xf32>
    %6 = arith.mulf %3, %5 : vector<8x768xf32>
    %c0_4 = arith.constant 0 : index
    %c0_5 = arith.constant 0 : index
    %7 = vector.load %arg4[%c0_4, %c0_5] : memref<1x768xf32, #tpu.memory_space<vmem>>, vector<1x768xf32>
    %8 = vector.broadcast %7 : vector<1x768xf32> to vector<8x768xf32>
    %9 = arith.addf %6, %8 : vector<8x768xf32>
    %cst = arith.constant 0.000000e+00 : f32
    %cst_6 = arith.constant 1.000000e+00 : f32
    %10 = vector.broadcast %cst : f32 to vector<8x768xf32>
    %11 = arith.maximumf %10, %9 : vector<8x768xf32>
    %12 = vector.broadcast %cst_6 : f32 to vector<8x768xf32>
    %13 = arith.minimumf %12, %11 : vector<8x768xf32>
    %c0_7 = arith.constant 0 : index
    %c0_8 = arith.constant 0 : index
    %14 = vector.load %arg3[%c0_7, %c0_8] : memref<8x768xf32, #tpu.memory_space<vmem>>, vector<8x768xf32>
    %cst_9 = arith.constant 0.00999999977 : f32
    %15 = vector.broadcast %cst_9 : f32 to vector<8x768xf32>
    %16 = arith.mulf %14, %15 : vector<8x768xf32>
    %17 = arith.addf %13, %16 : vector<8x768xf32>
    %c0_10 = arith.constant 0 : index
    %c0_11 = arith.constant 0 : index
    %18 = vector.load %arg9[%c0_10, %c0_11] : memref<8x128xf32, #tpu.memory_space<vmem>>, vector<8x128xf32>
    %19 = arith.truncf %17 : vector<8x768xf32> to vector<8x768xbf16>
    %c0_12 = arith.constant 0 : index
    %c0_13 = arith.constant 0 : index
    %20 = vector.load %arg6[%c0_12, %c0_13] : memref<768x128xbf16, #tpu.memory_space<vmem>>, vector<768x128xbf16>
    %cst_14 = arith.constant dense<0.000000e+00> : vector<8x128xf32>
    %21 = tpu.matmul %19, %20, %cst_14 {dimension_numbers = #tpu.dot_dimension_numbers<[1], [0], [0], [1], [0, 0, 1, 1], [], []>} : vector<8x768xbf16>, vector<768x128xbf16>, vector<8x128xf32> -> vector<8x128xf32>
    %22 = arith.addf %18, %21 : vector<8x128xf32>
    %c0_15 = arith.constant 0 : index
    %c0_16 = arith.constant 0 : index
    %23 = vector.load %arg9[%c0_15, %c0_16] : memref<8x128xf32, #tpu.memory_space<vmem>>, vector<8x128xf32>
    tpu.vector_store %arg9[%c0_15, %c0_16], %22 {strides = array<i32>} : memref<8x128xf32, #tpu.memory_space<vmem>>, vector<8x128xf32>,
    %c0_i32_17 = arith.constant 0 : i32
    %24 = arith.cmpi eq, %arg1, %c0_i32_17 : i32
    %25 = arith.extui %24 : i1 to i32
    %c0_i32_18 = arith.constant 0 : i32
    %26 = arith.cmpi ne, %25, %c0_i32_18 : i32
    scf.if %26 {
      %c0_19 = arith.constant 0 : index
      %c0_20 = arith.constant 0 : index
      %27 = vector.load %arg9[%c0_19, %c0_20] : memref<8x128xf32, #tpu.memory_space<vmem>>, vector<8x128xf32>
      %c0_21 = arith.constant 0 : index
      %c0_22 = arith.constant 0 : index
      %28 = vector.load %arg7[%c0_21, %c0_22] : memref<1x128xf32, #tpu.memory_space<vmem>>, vector<1x128xf32>
      %29 = vector.broadcast %28 : vector<1x128xf32> to vector<8x128xf32>
      %30 = arith.subf %27, %29 : vector<8x128xf32>
      %31 = arith.mulf %30, %30 : vector<8x128xf32>
      %cst_23 = arith.constant dense<0.000000e+00> : vector<8xf32>
      %32 = vector.multi_reduction <add>, %31, %cst_23 [1] : vector<8x128xf32> to vector<8xf32>
      %33 = vector.shape_cast %32 : vector<8xf32> to vector<8x1xf32>
      %cst_24 = arith.constant 9.99999996E-13 : f32
      %34 = vector.broadcast %cst_24 : f32 to vector<8x1xf32>
      %35 = arith.addf %33, %34 : vector<8x1xf32>
      %36 = math.rsqrt %35 : vector<8x1xf32>
      %37 = vector.broadcast %36 : vector<8x1xf32> to vector<8x128xf32>
      %38 = arith.mulf %30, %37 : vector<8x128xf32>
      %c0_25 = arith.constant 0 : index
      %c0_26 = arith.constant 0 : index
      %39 = vector.load %arg9[%c0_25, %c0_26] : memref<8x128xf32, #tpu.memory_space<vmem>>, vector<8x128xf32>
      tpu.vector_store %arg9[%c0_25, %c0_26], %38 {strides = array<i32>} : memref<8x128xf32, #tpu.memory_space<vmem>>, vector<8x128xf32>,
      %c0_27 = arith.constant 0 : index
      %c0_28 = arith.constant 0 : index
      %40 = vector.load %arg8[%c0_27, %c0_28] : memref<1x128xf32, #tpu.memory_space<vmem>>, vector<1x128xf32>
      %41 = vector.broadcast %40 : vector<1x128xf32> to vector<8x128xf32>
      %42 = arith.subf %41, %38 : vector<8x128xf32>
      %43 = arith.mulf %42, %42 : vector<8x128xf32>
      %cst_29 = arith.constant dense<0.000000e+00> : vector<8xf32>
      %44 = vector.multi_reduction <add>, %43, %cst_29 [1] : vector<8x128xf32> to vector<8xf32>
      %45 = vector.shape_cast %44 : vector<8xf32> to vector<8x1xf32>
      %46 = vector.shape_cast %45 : vector<8x1xf32> to vector<8x1xf32>
      %47 = vector.broadcast %46 : vector<8x1xf32> to vector<8x128xf32>
      %c0_30 = arith.constant 0 : index
      %c0_31 = arith.constant 0 : index
      %48 = vector.load %arg10[%c0_30, %c0_31] : memref<8x128xf32, #tpu.memory_space<vmem>>, vector<8x128xf32>
      tpu.vector_store %arg10[%c0_30, %c0_31], %47 {strides = array<i32>} : memref<8x128xf32, #tpu.memory_space<vmem>>, vector<8x128xf32>,
    } else {
    }
    return
  }
  func.func @transform_0(%arg0: i32, %arg1: i32) -> (i32, i32) {
    %c0_i32 = arith.constant 0 : i32
    return %arg0, %arg1 : i32, i32
  }
  func.func @transform_1(%arg0: i32, %arg1: i32) -> (i32, i32) {
    %c0_i32 = arith.constant 0 : i32
    return %arg0, %arg1 : i32, i32
  }
  func.func @transform_2(%arg0: i32, %arg1: i32) -> (i32, i32) {
    %c0_i32 = arith.constant 0 : i32
    %c0_i32_0 = arith.constant 0 : i32
    return %c0_i32, %arg1 : i32, i32
  }
  func.func @transform_3(%arg0: i32, %arg1: i32) -> (i32, i32) {
    %c0_i32 = arith.constant 0 : i32
    %c0_i32_0 = arith.constant 0 : i32
    return %c0_i32, %arg1 : i32, i32
  }
  func.func @transform_4(%arg0: i32, %arg1: i32) -> (i32, i32) {
    %c0_i32 = arith.constant 0 : i32
    %c0_i32_0 = arith.constant 0 : i32
    return %arg1, %c0_i32 : i32, i32
  }
  func.func @transform_5(%arg0: i32, %arg1: i32) -> (i32, i32) {
    %c0_i32 = arith.constant 0 : i32
    %c0_i32_0 = arith.constant 0 : i32
    %c0_i32_1 = arith.constant 0 : i32
    return %c0_i32, %c0_i32_0 : i32, i32
  }
  func.func @transform_6(%arg0: i32, %arg1: i32) -> (i32, i32) {
    %c0_i32 = arith.constant 0 : i32
    %c0_i32_0 = arith.constant 0 : i32
    %c0_i32_1 = arith.constant 0 : i32
    return %c0_i32, %c0_i32_0 : i32, i32
  }
  func.func @transform_7(%arg0: i32, %arg1: i32) -> (i32, i32) {
    %c0_i32 = arith.constant 0 : i32
    %c0_i32_0 = arith.constant 0 : i32
    return %arg0, %c0_i32 : i32, i32
  }
  func.func @transform_8(%arg0: i32, %arg1: i32) -> (i32, i32) {
    %c0_i32 = arith.constant 0 : i32
    %c0_i32_0 = arith.constant 0 : i32
    return %arg0, %c0_i32 : i32, i32
  }
}

</mosaic_0001>

<bundles_post_ra>
// kernel: forward.1
= control target key start
LH: loop header
LB: loop body
LE: loop exit
PB: predicated region body
PF: predicated region fallthrough
CT: control target
= control target key end

     0   :  { %14 = vsyncpa [#allocation3], 0  ;;  %s907_s27 = smov [#allocation2]   ;;  %s1045_s0 = inlined_call_operand.vmem [shape: f32[8,768], index: 0, kind: input, shape index: {}]   ;;  %s1046_s1 = inlined_call_operand.vmem [shape: f32[8,768], index: 1, kind: input, shape index: {}]   ;;  %s1047_s2 = inlined_call_operand.vmem [shape: f32[1,768], index: 2, kind: input, shape index: {}]   ;;  %s1048_s3 = inlined_call_operand.vmem [shape: f32[1,768], index: 3, kind: input, shape index: {}]   ;;  %s1049_s4 = inlined_call_operand.hbm [shape: bf16[768,128], index: 4, kind: input, shape index: {}]   ;;  %s1050_s5 = inlined_call_operand.vmem [shape: f32[1,128], index: 5, kind: input, shape index: {}]   ;;  %s1051_s6 = inlined_call_operand.vmem [shape: f32[1,128], index: 6, kind: input, shape index: {}]   ;;  %s1052_s7 = inlined_call_operand.vmem [shape: f32[8,128], index: 7, kind: output, shape index: {0}]   ;;  %s1053_s8 = inlined_call_operand.vmem [shape: f32[8,128], index: 8, kind: output, shape index: {1}]  }
   0x1   :  { %s28_s28 = sshll.u32 %s907_s27, 4  ;;  %s883_s9 = scalar_lea.hbm %s1049_s4, 6144  ;;  %s29_s28 = int_to_ptr.vmem [resolvable:$true] %s28_s28 }
   0x2   :  { %p884_p0 = scmp.ne.s32.totalorder %s1049_s4, %s883_s9  ;;  %p887_p1 = scmp.lt.u32.totalorder %s883_s9, %s1049_s4 }
   0x4   :  { %p889_p2 = pnand %p887_p1, %p884_p0 }
   0x6   :  { %892 = shalt.err (!%p889_p2)
}
   0x7   :  { %s893_s14 = scalar_lea.vmem %s29_s28, 6144  ;;  %p898_p4 = scmp.lt.s32.totalorder %s29_s28, %s29_s28 }
   0x8   :  { %p894_p3 = scmp.ne.s32.totalorder %s29_s28, %s893_s14  ;;  %p899_p5 = scmp.lt.s32.totalorder %s893_s14, %s893_s14 }
   0xa   :  { %p900_p6 = por %p899_p5, %p898_p4 }
   0xc   :  { %p901_p7 = pnand %p900_p6, %p894_p3 }
   0xe   :  { %904 = shalt.err (!%p901_p7)
}
   0xf   :  { %s908_s15 = smov 64   ;;  %s909_s16 = smov 4  }
  0x10   :  { %34 = dma.hbm_to_vmem [thread:$0]  %s1049_s4, 6144, %s29_s28, [#allocation3], %s908_s15, %s908_s15, %s909_s16  }
  0x11   :  { %905 = dma.done.wait [#allocation3], 6144  }
  0x12   :  { %906 = vsyncadd [#allocation3], 4294961152  ;;  %v833_v0 = vld [vmem:[#allocation2 + $0x40] sm:$0xff]   ;;  %v837_v4 = vld [vmem:[#allocation2 + $0x48] sm:$0xff]   ;;  %v56_v21 = vlaneseq }
  0x13   :  { %v834_v1 = vld [vmem:[#allocation2 + $0xc0] sm:$0xff]   ;;  %763 = vmatprep.subr.bf16.mxu0 %v833_v0  ;;  %v838_v5 = vld [vmem:[#allocation2 + $0xc8] sm:$0xff]   ;;  %v841_v8 = vld [vmem:[#allocation2 + $0x50] sm:$0xff]  }
  0x14   :  { %v835_v2 = vld [vmem:[#allocation2] sm:$0xff]   ;;  %785 = vmatprep.subr.bf16.mxu1 %v834_v1  ;;  %v839_v6 = vld [vmem:[#allocation2 + $0x8] sm:$0xff]   ;;  %v842_v9 = vld [vmem:[#allocation2 + $0xd0] sm:$0xff]   ;;  %v967_v26 = vshrl.u32 %v56_v21, 7 }
  0x15   :  { %v836_v3 = vld [vmem:[#allocation2 + $0x80] sm:$0xff]   ;;  %764 = vmatpush3.bf16.msra.mxu0 %v835_v2  ;;  %v840_v7 = vld [vmem:[#allocation2 + $0x88] sm:$0xff]   ;;  %v843_v10 = vld [vmem:[#allocation2 + $0x10] sm:$0xff]  }
  0x16   :  { %786 = vmatpush3.bf16.msra.mxu1 %v836_v3  ;;  %765 = vmatprep.subr.bf16.mxu0 %v837_v4  ;;  %v844_v11 = vld [vmem:[#allocation2 + $0x90] sm:$0xff]   ;;  %v845_v12 = vld [vmem:[#allocation2 + $0x58] sm:$0xff]   ;;  %v849_v16 = vld [vmem:[#allocation2 + $0x60] sm:$0xff]   ;;  %v62_v31 = vsub.s32 1, %v967_v26  ;;  %v70_v33 = vsub.s32 3, %v967_v26  ;;  %v58_v35 = vsub.s32 0, %v967_v26 }
  0x17   :  { %787 = vmatprep.subr.bf16.mxu1 %v838_v5  ;;  %v846_v13 = vld [vmem:[#allocation2 + $0xd8] sm:$0xff]   ;;  %v850_v17 = vld [vmem:[#allocation2 + $0xe0] sm:$0xff]   ;;  %v853_v20 = vld [vmem:[#allocation2 + $0x68] sm:$0xff]   ;;  %v66_v37 = vsub.s32 2, %v967_v26 }
  0x18   :  { %v847_v14 = vld [vmem:[#allocation2 + $0x18] sm:$0xff]   ;;  %v851_v18 = vld [vmem:[#allocation2 + $0x20] sm:$0xff]   ;;  %v854_v22 = vld [vmem:[#allocation2 + $0xe8] sm:$0xff]  }
  0x19   :  { %766 = vmatpush3.bf16.msra.mxu0 %v839_v6  ;;  %v848_v15 = vld [vmem:[#allocation2 + $0x98] sm:$0xff]   ;;  %v852_v19 = vld [vmem:[#allocation2 + $0xa0] sm:$0xff]   ;;  %v855_v23 = vld [vmem:[#allocation2 + $0x28] sm:$0xff]  }
  0x1a   :  { %788 = vmatpush3.bf16.msra.mxu1 %v840_v7  ;;  %767 = vmatprep.subr.bf16.mxu0 %v841_v8  ;;  %v856_v24 = vld [vmem:[#allocation2 + $0xa8] sm:$0xff]   ;;  %v857_v25 = vld [vmem:[#allocation2 + $0x70] sm:$0xff]   ;;  %v861_v30 = vld [vmem:[#allocation2 + $0x78] sm:$0xff]  }
  0x1b   :  { %789 = vmatprep.subr.bf16.mxu1 %v842_v9  ;;  %v858_v27 = vld [vmem:[#allocation2 + $0xf0] sm:$0xff]   ;;  %v862_v32 = vld [vmem:[#allocation2 + $0xf8] sm:$0xff]   ;;  %v49_v38 = vld [vmem:[%s1045_s0 + $0x8] sm:$0xff] }
  0x1c   :  { %v859_v28 = vld [vmem:[#allocation2 + $0x30] sm:$0xff]   ;;  %v863_v34 = vld [vmem:[#allocation2 + $0x38] sm:$0xff]   ;;  %v979_v39 = vld [vmem:[%s1048_s3] sm:$0x3f] }
  0x1d   :  { %768 = vmatpush3.bf16.msra.mxu0 %v843_v10  ;;  %v860_v29 = vld [vmem:[#allocation2 + $0xb0] sm:$0xff]   ;;  %v864_v36 = vld [vmem:[#allocation2 + $0xb8] sm:$0xff]   ;;  %v984_v40 = vld [vmem:[%s1047_s2] sm:$0x3f]  ;;  %v63_v41 = vrot.slane %v979_v39, %v62_v31  ;;  %v71_v45 = vrot.slane %v979_v39, %v70_v33  ;;  %v59_v49 = vrot.slane %v979_v39, %v58_v35  ;;  %v67_v56 = vrot.slane %v979_v39, %v66_v37 }
  0x1e   :  { %790 = vmatpush3.bf16.msra.mxu1 %v844_v11  ;;  %769 = vmatprep.subr.bf16.mxu0 %v845_v12  ;;  %v101_v42 = vrot.slane %v984_v40, %v62_v31  ;;  %v143_v43 = vld [vmem:[%s1046_s1 + $0x8] sm:$0xff]  ;;  %v51_v44 = vld [vmem:[%s1045_s0 + $0x18] sm:$0xff]  ;;  %v109_v46 = vrot.slane %v984_v40, %v70_v33  ;;  %v48_v48 = vld [vmem:[%s1045_s0] sm:$0xff]  ;;  %v97_v50 = vrot.slane %v984_v40, %v58_v35 }
  0x1f   :  { %791 = vmatprep.subr.bf16.mxu1 %v846_v13  ;;  %v145_v47 = vld [vmem:[%s1046_s1 + $0x18] sm:$0xff]  ;;  %v87_v51 = vmul.f32 %v63_v41, %v49_v38  ;;  %v149_v52 = vmul.f32 0.01, %v143_v43  ;;  %v89_v53 = vmul.f32 %v71_v45, %v51_v44  ;;  %v142_v54 = vld [vmem:[%s1046_s1] sm:$0xff]  ;;  %v50_v55 = vld [vmem:[%s1045_s0 + $0x10] sm:$0xff]  ;;  %v86_v58 = vmul.f32 %v59_v49, %v48_v48 }
  0x20   :  { %v151_v57 = vmul.f32 0.01, %v145_v47  ;;  %v105_v59 = vrot.slane %v984_v40, %v66_v37  ;;  %v144_v60 = vld [vmem:[%s1046_s1 + $0x10] sm:$0xff]  ;;  %v865_v61 = vld [vmem:[#allocation2 + $0x140] sm:$0xff]   ;;  %v88_v0 = vmul.f32 %v67_v56, %v50_v55  ;;  %v148_v2 = vmul.f32 0.01, %v142_v54 }
  0x21   :  { %770 = vmatpush3.bf16.msra.mxu0 %v847_v14  ;;  %v125_v62 = vadd.f32 %v101_v42, %v87_v51  ;;  %v127_v63 = vadd.f32 %v109_v46, %v89_v53  ;;  %v124_v1 = vadd.f32 %v97_v50, %v86_v58  ;;  %v150_v6 = vmul.f32 0.01, %v144_v60  ;;  %v147_v35 = vld [vmem:[%s1046_s1 + $0x28] sm:$0xff]  ;;  %v872_v41 = vld [vmem:[#allocation2 + $0x118] sm:$0xff]   ;;  %v873_v43 = vld [vmem:[#allocation2 + $0x160] sm:$0xff]  }
  0x22   :  { %792 = vmatpush3.bf16.msra.mxu1 %v848_v15  ;;  %771 = vmatprep.subr.bf16.mxu0 %v849_v16  ;;  %v126_v5 = vadd.f32 %v105_v59, %v88_v0  ;;  %v153_v42 = vmul.f32 0.01, %v147_v35  ;;  %v874_v46 = vld [vmem:[#allocation2 + $0x120] sm:$0xff]   ;;  %v875_v48 = vld [vmem:[#allocation2 + $0x168] sm:$0xff]   ;;  %v878_v55 = vld [vmem:[#allocation2 + $0x130] sm:$0xff]  }
  0x23   :  { %793 = vmatprep.subr.bf16.mxu1 %v850_v17  ;;  %v131_v3 = vmax.f32 %v125_v62, 0.0  ;;  %v133_v4 = vmax.f32 %v127_v63, 0.0  ;;  %v130_v7 = vmax.f32 %v124_v1, 0.0  ;;  %v876_v51 = vld [vmem:[#allocation2 + $0x128] sm:$0xff]   ;;  %v879_v56 = vld [vmem:[#allocation2 + $0x178] sm:$0xff]  }
  0x24   :  { %v132_v10 = vmax.f32 %v126_v5, 0.0  ;;  %v880_v58 = vld [vmem:[#allocation2 + $0x138] sm:$0xff]  }
  0x25   :  { %772 = vmatpush3.bf16.msra.mxu0 %v851_v18  ;;  %v137_v8 = vmin.f32 %v131_v3, 1.0  ;;  %v139_v9 = vmin.f32 %v133_v4, 1.0  ;;  %v136_v11 = vmin.f32 %v130_v7, 1.0 }
  0x26   :  { %794 = vmatpush3.bf16.msra.mxu1 %v852_v19  ;;  %773 = vmatprep.subr.bf16.mxu0 %v853_v20  ;;  %v138_v14 = vmin.f32 %v132_v10, 1.0  ;;  %v866_v19 = vld [vmem:[#allocation2 + $0x100] sm:$0xff]   ;;  %v78_v20 = vsub.s32 5, %v967_v26 }
  0x27   :  { %795 = vmatprep.subr.bf16.mxu1 %v854_v22  ;;  %v155_v12 = vadd.f32 %v149_v52, %v137_v8  ;;  %v157_v13 = vadd.f32 %v151_v57, %v139_v9  ;;  %v154_v15 = vadd.f32 %v148_v2, %v136_v11  ;;  %v867_v22 = vld [vmem:[#allocation2 + $0x148] sm:$0xff]   ;;  %v877_v52 = vld [vmem:[#allocation2 + $0x170] sm:$0xff]  }
  0x28   :  { %v156_v18 = vadd.f32 %v150_v6, %v138_v14 }
  0x29   :  { %774 = vmatpush3.bf16.msra.mxu0 %v855_v23  ;;  %v162_v16 = vpack.c.bf16 %v155_v12, %v155_v12  ;;  %v164_v17 = vpack.c.bf16 %v157_v13, %v157_v13  ;;  %v161_v21 = vpack.c.bf16 %v154_v15, %v154_v15  ;;  %v761_v13 = vld [vmem:[%s1050_s5] ss:$0 sm:$0xff] }
  0x2a   :  { %796 = vmatpush3.bf16.msra.mxu1 %v856_v24  ;;  %775 = vmatprep.subr.bf16.mxu0 %v857_v25  ;;  %v163_v23 = vpack.c.bf16 %v156_v18, %v156_v18  ;;  %v74_v24 = vsub.s32 4, %v967_v26  ;;  %v868_v25 = vld [vmem:[#allocation2 + $0x108] sm:$0xff]   ;;  %v52_v26 = vld [vmem:[%s1045_s0 + $0x20] sm:$0xff] }
  0x2b   :  { %797 = vmatprep.subr.bf16.mxu1 %v858_v27  ;;  %583 = vmatprep.mubr.bf16.mxu0 %v162_v16  ;;  %v79_v27 = vrot.slane %v979_v39, %v78_v20 }
  0x2c   :  { %623 = vmatprep.mubr.bf16.mxu1 %v164_v17  ;;  %v75_v31 = vrot.slane %v979_v39, %v74_v24  ;;  %v113_v38 = vrot.slane %v984_v40, %v74_v24 }
  0x2d   :  { %776 = vmatpush3.bf16.msra.mxu0 %v859_v28  ;;  %v869_v28 = vld [vmem:[#allocation2 + $0x150] sm:$0xff]  }
  0x2e   :  { %798 = vmatpush3.bf16.msra.mxu1 %v860_v29  ;;  %777 = vmatprep.subr.bf16.mxu0 %v861_v30  ;;  %v117_v29 = vrot.slane %v984_v40, %v78_v20  ;;  %v53_v30 = vld [vmem:[%s1045_s0 + $0x28] sm:$0xff]  ;;  %v90_v37 = vmul.f32 %v75_v31, %v52_v26  ;;  %v146_v40 = vld [vmem:[%s1046_s1 + $0x20] sm:$0xff] }
  0x2f   :  { %799 = vmatprep.subr.bf16.mxu1 %v862_v32  ;;  %v870_v32 = vld [vmem:[#allocation2 + $0x110] sm:$0xff]   ;;  %v91_v33 = vmul.f32 %v79_v27, %v53_v30  ;;  %v152_v54 = vmul.f32 0.01, %v146_v40 }
  0x30   :  { %v128_v45 = vadd.f32 %v113_v38, %v90_v37 }
  0x31   :  { %778 = vmatpush3.bf16.msra.mxu0 %v863_v34  ;;  %v871_v34 = vld [vmem:[#allocation2 + $0x158] sm:$0xff]  }
  0x32   :  { %800 = vmatpush3.bf16.msra.mxu1 %v864_v36  ;;  %807 = vmatprep.subr.bf16.mxu0 %v865_v61  ;;  %v129_v36 = vadd.f32 %v117_v29, %v91_v33  ;;  %v134_v50 = vmax.f32 %v128_v45, 0.0 }
  0x34   :  { %584 = vmatmul.mubr.bf16.vlgmr.msra.gmra.mrb[0].mxu0 %v161_v21  ;;  %v135_v39 = vmax.f32 %v129_v36, 0.0  ;;  %v140_v53 = vmin.f32 %v134_v50, 1.0 }
  0x35   :  { %624 = vmatmul.mubr.bf16.vlgmr.msra.gmra.mrb[0].mxu1 %v163_v23  ;;  %808 = vmatpush3.bf16.msra.mxu0 %v866_v19  ;;  %v762_v19 = vld [vmem:[%s1051_s6] ss:$0 sm:$0xff] }
  0x36   :  { %809 = vmatprep.subr.bf16.mxu0 %v867_v22  ;;  %v141_v44 = vmin.f32 %v135_v39, 1.0  ;;  %v158_v57 = vadd.f32 %v152_v54, %v140_v53 }
  0x38   :  { %v159_v47 = vadd.f32 %v153_v42, %v141_v44  ;;  %v165_v59 = vpack.c.bf16 %v158_v57, %v158_v57 }
  0x39   :  { %810 = vmatpush3.bf16.msra.mxu0 %v868_v25 }
  0x3a   :  { %811 = vmatprep.subr.bf16.mxu0 %v869_v28  ;;  %v166_v49 = vpack.c.bf16 %v159_v47, %v159_v47 }
  0x3c   :  { %663 = vmatprep.mubr.bf16.mxu0 %v166_v49 }
  0x3d   :  { %812 = vmatpush3.bf16.msra.mxu0 %v870_v32 }
  0x3e   :  { %813 = vmatprep.subr.bf16.mxu0 %v871_v34 }
  0x41   :  { %814 = vmatpush3.bf16.msra.mxu0 %v872_v41 }
  0x42   :  { %815 = vmatprep.subr.bf16.mxu0 %v873_v43 }
  0x45   :  { %816 = vmatpush3.bf16.msra.mxu0 %v874_v46 }
  0x46   :  { %817 = vmatprep.subr.bf16.mxu0 %v875_v48 }
  0x49   :  { %818 = vmatpush3.bf16.msra.mxu0 %v876_v51 }
  0x4a   :  { %819 = vmatprep.subr.bf16.mxu0 %v877_v52 }
  0x4d   :  { %820 = vmatpush3.bf16.msra.mxu0 %v878_v55 }
  0x4e   :  { %821 = vmatprep.subr.bf16.mxu0 %v879_v56 }
  0x51   :  { %822 = vmatpush3.bf16.msra.mxu0 %v880_v58 }
  0x54   :  { %664 = vmatmul.mubr.bf16.vlgmr.msra.gmra.mrb[4].mxu0 %v165_v59 }
 0x107   :  { %v779_v60 = vpop.f32.mrb[0].mxu0 }
 0x108   :  { %v801_v61 = vpop.f32.mrb[0].mxu1  ;;  %v780_v62 = vpop.f32.mrb[1].mxu0 }
 0x109   :  { %v781_v63 = vadd.f32 %v780_v62, %v779_v60  ;;  %v802_v0 = vpop.f32.mrb[1].mxu1  ;;  %v782_v1 = vpop.f32.mrb[2].mxu0 }
 0x10a   :  { %v803_v2 = vadd.f32 %v802_v0, %v801_v61  ;;  %v783_v3 = vpop.f32.mrb[3].mxu0  ;;  %v804_v4 = vpop.f32.mrb[2].mxu1 }
 0x10b   :  { %v805_v5 = vpop.f32.mrb[3].mxu1 }
 0x10c   :  { %v626_v6 = vadd.f32 %v803_v2, %v781_v63 }
 0x127   :  { %v823_v7 = vpop.f32.mrb[4].mxu0 }
 0x128   :  { %v824_v8 = vpop.f32.mrb[5].mxu0 }
 0x129   :  { %v825_v9 = vadd.f32 %v824_v8, %v823_v7  ;;  %v826_v10 = vpop.f32.mrb[6].mxu0 }
 0x12a   :  { %v827_v11 = vpop.f32.mrb[7].mxu0 }
 0x12b   :  { %v666_v12 = vadd.f32 %v825_v9, %v626_v6 }
 0x12d   :  { %v684_v14 = vsub.f32 %v666_v12, %v761_v13 }
 0x12f   :  { %v685_v15 = vmul.f32 %v684_v14, %v684_v14 }
 0x131   :  { %686 = vadd.xlane.f32.xlu0 %v685_v15 }
 0x1be   :  { %v687_v16 = vpop.xlane.xlu0 %686 }
 0x1bf   :  { %v688_v17 = vadd.f32 1e-12, %v687_v16 }
 0x1c1   :  { %881 = vrsqrt.f32 %v688_v17 }
 0x1cb   :  { %v882_v18 = vpop.eup %881 }
 0x1cc   :  { %v690_v20 = vmul.f32 %v882_v18, %v684_v14 }
 0x1ce   :  { %v699_v21 = vsub.f32 %v762_v19, %v690_v20  ;;  %691 = vst [vmem:[%s1052_s7] sm:$0xff] %v690_v20 }
 0x1d0   :  { %v700_v22 = vmul.f32 %v699_v21, %v699_v21 }
 0x1d2   :  { %701 = vadd.xlane.f32.xlu0 %v700_v22 }
 0x25f   :  { %v702_v23 = vpop.xlane.xlu0 %701 }
 0x260   :  { %703 = vst [vmem:[%s1053_s8] sm:$0xff] %v702_v23 }
 0x261   :  { %712 = vsyncpa [#allocation3], 1 }

</bundles_post_ra>
